<compile_context>
chip_gen: v6e
topology: v6e:2x2x1
jax: 0.10.0
libtpu: 0.0.40
codegen_flags: <defaults>
</compile_context>

<pallas_src>
import jax
import jax.numpy as jnp
from jax.experimental import pallas as pl
from jax.experimental.pallas import tpu as pltpu


def psap_kernel(x_ref, wr_ref, wup_ref, wql_ref, wvl_ref, o_ref):
    # x_ref / o_ref block: (bt, C, HW) in the input's native dtype.
    # weights (f32): wr (1+ch, C), wup (C, 1+ch) [column 0 zero], wql (ch, C), wvl (ch, C)
    ch = wql_ref.shape[0]
    wr = wr_ref[...]
    wup = wup_ref[...]
    wql = wql_ref[...]
    wvl = wvl_ref[...]

    def sigmoid(z):                      # z: f32 -> EUP exp + approx reciprocal
        return pl.reciprocal(1.0 + jnp.exp(-z), approx=True)

    def softmax_lanes(z):                # softmax over the lane (HW) axis, z: (1, HW) f32
        m = jnp.max(z, axis=1, keepdims=True)
        e = jnp.exp(z - m)
        return e * pl.reciprocal(jnp.sum(e, axis=1, keepdims=True), approx=True)

    bt = x_ref.shape[0]
    for i in range(bt):                  # small static loop over packed batch images
        x = x_ref[i]                     # (C, HW), native dtype (bf16 stays bf16 on the MXU)

        # ---------- spatial pool: fused [q_right; v_right] projection ----------
        r = jnp.dot(wr.astype(x.dtype), x,
                    preferred_element_type=jnp.float32)              # (1+ch, HW) f32
        p = softmax_lanes(r[0:1, :])                                  # (1, HW)
        cvec = jnp.sum(r * p, axis=1, keepdims=True)                  # (1+ch, 1); row 0 unused
        # wup's zero column drops the unused row -> up = w_up @ context
        s = sigmoid(jnp.dot(wup, cvec,
                            preferred_element_type=jnp.float32))      # (C, 1) spatial scale
        x1 = x * s.astype(x.dtype)                                    # (C, HW)

        # ---------- channel pool (avg-pool commutes with the 1x1 convs) ----------
        # f32 accumulation for the mean (streamed per-vreg; no resident f32 copy needed).
        xm1 = jnp.mean(x1.astype(jnp.float32), axis=1, keepdims=True)  # (C, 1)
        avg = jnp.dot(wql, xm1, preferred_element_type=jnp.float32)    # (ch, 1)
        wv_avg = jnp.sum(wvl * avg, axis=0, keepdims=True)             # (1, C) = avg^T @ w_vl
        ctx = jnp.dot(wv_avg.astype(x1.dtype), x1,
                      preferred_element_type=jnp.float32)              # (1, HW)
        cs2 = 2.0 * sigmoid(softmax_lanes(ctx))                        # fold final "a + a" == 2a
        o_ref[i] = (x1 * cs2.astype(x1.dtype)).astype(o_ref.dtype)


def psap_forward(x_nchw, w_qr, w_vr, w_up, w_ql, w_vl, *, block_batch=None):
    """x_nchw: (B, c1, H, W); weights are PyTorch-style (out, in) 1x1-conv weights."""
    B, C, H, W = x_nchw.shape
    HW = H * W
    ch = w_vr.shape[0]
    C2 = w_up.shape[0]
    assert C2 == C, "PSAP requires c1 == c2 for the in-place broadcast to work"

    x = x_nchw.reshape(B, C, HW)                       # pure reshape, no HBM transpose
    f32 = jnp.float32
    # Fused right-branch projection: row 0 = q_right (mask), rows 1..ch = v_right.
    w_r = jnp.concatenate([w_qr, w_vr], axis=0).astype(f32)                     # (1+ch, C)
    # conv_up with a zero column prepended so it consumes the fused (1+ch, 1) context.
    w_up_x = jnp.concatenate([jnp.zeros((C2, 1), f32), w_up.astype(f32)], 1)    # (C, 1+ch)
    w_ql_ = w_ql.astype(f32)                                                    # (ch, C)
    w_vl_ = w_vl.astype(f32)                                                    # (ch, C)

    # ---- choose how many images to pack per block ----
    itemsize = jnp.dtype(x.dtype).itemsize
    per_img = C * HW * itemsize
    if block_batch is None:
        bt = max(1, int((2 * 1024 * 1024) // per_img))   # ~2 MiB blocks amortize grid overhead
        if B > 1:
            bt = min(bt, B // 2)                         # keep >= 2 grid steps (v7x megacore)
        bt = max(1, min(bt, B))
        while B % bt:                                    # block batch must divide B exactly
            bt -= 1
    else:
        bt = block_batch
        assert B % bt == 0
    grid = (B // bt,)

    # ---- explicit VMEM budget: in/out double-buffered + weights + f32 intermediates ----
    block_bytes = bt * per_img
    w_bytes = 4 * int(w_r.size + w_up_x.size + w_ql_.size + w_vl_.size)
    inter_bytes = 4 * (1 + ch) * HW * 4
    need = 2 * 2 * block_bytes + 2 * w_bytes + inter_bytes
    vmem_limit = int(min(max(2 * need, 32 * 1024 * 1024), 48 * 1024 * 1024))
    # TODO(synk): a single image with C*HW*itemsize >> 16 MiB would need an HW-tiled
    # two-pass (flash-style) softmax to stay inside v7x's 64 MiB VMEM; not implemented here.

    out = pl.pallas_call(
        psap_kernel,
        out_shape=jax.ShapeDtypeStruct((B, C, HW), x.dtype),
        grid_spec=pltpu.PrefetchScalarGridSpec(
            num_scalar_prefetch=0,
            grid=grid,
            in_specs=[
                pl.BlockSpec((bt, C, HW), lambda b: (b, 0, 0)),
                pl.BlockSpec((1 + ch, C), lambda b: (0, 0)),
                pl.BlockSpec((C, 1 + ch), lambda b: (0, 0)),
                pl.BlockSpec((ch, C), lambda b: (0, 0)),
                pl.BlockSpec((ch, C), lambda b: (0, 0)),
            ],
            out_specs=pl.BlockSpec((bt, C, HW), lambda b: (b, 0, 0)),
        ),
        compiler_params=pltpu.CompilerParams(
            dimension_semantics=("parallel",),
            vmem_limit_bytes=vmem_limit,
        ),
    )(x, w_r, w_up_x, w_ql_, w_vl_)

    return out.reshape(B, C, H, W)


def psap_reference(x, w_qr, w_vr, w_up, w_ql, w_vl):
    """Pure-JAX reference in NCHW, mirroring the PyTorch module exactly."""
    B, C, H, W = x.shape
    HW = H * W

    def conv1x1(t, w):  # t: (B, Cin, H, W), w: (Cout, Cin)
        return jnp.einsum('oc,bchw->bohw', w, t)

    # spatial_pool
    input_x = conv1x1(x, w_vr).reshape(B, -1, HW)              # (B, ch, HW)
    mask = conv1x1(x, w_qr).reshape(B, 1, HW)
    mask = jax.nn.softmax(mask, axis=2)
    context = jnp.einsum('bcs,bos->bc', input_x, mask)         # (B, ch)
    context = conv1x1(context[:, :, None, None], w_up)         # (B, c2, 1, 1)
    x1 = x * jax.nn.sigmoid(context)

    # channel_pool on the in-place-updated x1
    g = conv1x1(x1, w_ql)                                      # (B, ch, H, W)
    avg = jnp.mean(g, axis=(2, 3))                             # (B, ch)
    theta = conv1x1(x1, w_vl).reshape(B, -1, HW)               # (B, ch, HW)
    ctx = jnp.einsum('bc,bcs->bs', avg, theta)                 # (B, HW)
    ctx = jax.nn.softmax(ctx, axis=1)
    ctx = jax.nn.sigmoid(ctx).reshape(B, 1, H, W)
    x2 = x1 * ctx

    return 2.0 * x2


if __name__ == "__main__":
    # Small deterministic config: c1 == c2 (required by the module's broadcast).
    B, c1, H, W = 2, 8, 16, 16
    c2 = c1
    ch = c2 // 2

    key = jax.random.PRNGKey(0)
    kx, k1, k2, k3, k4, k5 = jax.random.split(key, 6)
    x = jax.random.normal(kx, (B, c1, H, W), dtype=jnp.float32)

    # Conv2d 1x1 weights, PyTorch layout (out, in), squeezed.
    w_qr = 0.3 * jax.random.normal(k1, (1, c1), dtype=jnp.float32)
    w_vr = 0.3 * jax.random.normal(k2, (ch, c1), dtype=jnp.float32)
    w_up = 0.3 * jax.random.normal(k3, (c2, ch), dtype=jnp.float32)
    w_ql = 0.3 * jax.random.normal(k4, (ch, c1), dtype=jnp.float32)
    w_vl = 0.3 * jax.random.normal(k5, (ch, c1), dtype=jnp.float32)

    out = psap_forward(x, w_qr, w_vr, w_up, w_ql, w_vl)
    out = jax.block_until_ready(out)

    ref = psap_reference(x, w_qr, w_vr, w_up, w_ql, w_vl)
    assert out.shape == (B, c1, H, W)
    assert jnp.allclose(out, ref, rtol=1e-2, atol=1e-2), (
        f"max abs diff {jnp.max(jnp.abs(out - ref))}")

    print("KERNEL_OK")
</pallas_src>

<mosaic_0001>
module attributes {stable_mosaic.version = 11 : i64} {
  func.func @psap_kernel(%arg0: i32, %arg1: memref<1x8x256xf32, #tpu.memory_space<vmem>>, %arg2: memref<5x8xf32, #tpu.memory_space<vmem>>, %arg3: memref<8x5xf32, #tpu.memory_space<vmem>>, %arg4: memref<4x8xf32, #tpu.memory_space<vmem>>, %arg5: memref<4x8xf32, #tpu.memory_space<vmem>>, %arg6: memref<1x8x256xf32, #tpu.memory_space<vmem>>) attributes {dimension_semantics = [#tpu.dimension_semantics<parallel>], iteration_bounds = array<i64: 2>, scalar_prefetch = 0 : i64, scratch_operands = 0 : i64, tpu.core_type = #tpu.core_type<tc>, window_params = [{transform_indices = @transform_0, window_bounds = array<i64: 1, 8, 256>}, {pipeline_mode = #tpu.pipeline_mode<synchronous>, transform_indices = @transform_1, window_bounds = array<i64: 5, 8>}, {pipeline_mode = #tpu.pipeline_mode<synchronous>, transform_indices = @transform_2, window_bounds = array<i64: 8, 5>}, {pipeline_mode = #tpu.pipeline_mode<synchronous>, transform_indices = @transform_3, window_bounds = array<i64: 4, 8>}, {pipeline_mode = #tpu.pipeline_mode<synchronous>, transform_indices = @transform_4, window_bounds = array<i64: 4, 8>}, {transform_indices = @transform_5, window_bounds = array<i64: 1, 8, 256>}]} {
    %c0 = arith.constant 0 : index
    %c0_0 = arith.constant 0 : index
    %0 = vector.load %arg2[%c0, %c0_0] : memref<5x8xf32, #tpu.memory_space<vmem>>, vector<5x8xf32>
    %c0_1 = arith.constant 0 : index
    %c0_2 = arith.constant 0 : index
    %1 = vector.load %arg3[%c0_1, %c0_2] : memref<8x5xf32, #tpu.memory_space<vmem>>, vector<8x5xf32>
    %c0_3 = arith.constant 0 : index
    %c0_4 = arith.constant 0 : index
    %2 = vector.load %arg4[%c0_3, %c0_4] : memref<4x8xf32, #tpu.memory_space<vmem>>, vector<4x8xf32>
    %c0_5 = arith.constant 0 : index
    %c0_6 = arith.constant 0 : index
    %3 = vector.load %arg5[%c0_5, %c0_6] : memref<4x8xf32, #tpu.memory_space<vmem>>, vector<4x8xf32>
    %c0_7 = arith.constant 0 : index
    %c0_8 = arith.constant 0 : index
    %c0_9 = arith.constant 0 : index
    %4 = vector.load %arg1[%c0_7, %c0_8, %c0_9] : memref<1x8x256xf32, #tpu.memory_space<vmem>>, vector<1x8x256xf32>
    %5 = vector.shape_cast %4 : vector<1x8x256xf32> to vector<8x256xf32>
    %cst = arith.constant dense<0.000000e+00> : vector<5x256xf32>
    %6 = tpu.matmul %0, %5, %cst {dimension_numbers = #tpu.dot_dimension_numbers<[1], [0], [0], [1], [0, 0, 1, 1], [], []>} : vector<5x8xf32>, vector<8x256xf32>, vector<5x256xf32> -> vector<5x256xf32>
    %7 = vector.extract_strided_slice %6 {offsets = [0, 0], sizes = [1, 256], strides = [1, 1]} : vector<5x256xf32> to vector<1x256xf32>
    %cst_10 = arith.constant dense<0xFF800000> : vector<1xf32>
    %8 = vector.multi_reduction <maximumf>, %7, %cst_10 [1] : vector<1x256xf32> to vector<1xf32>
    %9 = vector.shape_cast %8 : vector<1xf32> to vector<1x1xf32>
    %10 = vector.broadcast %9 : vector<1x1xf32> to vector<1x256xf32>
    %11 = arith.subf %7, %10 : vector<1x256xf32>
    %12 = math.exp %11 : vector<1x256xf32>
    %cst_11 = arith.constant dense<0.000000e+00> : vector<1xf32>
    %13 = vector.multi_reduction <add>, %12, %cst_11 [1] : vector<1x256xf32> to vector<1xf32>
    %14 = vector.shape_cast %13 : vector<1xf32> to vector<1x1xf32>
    %15 = tpu.reciprocal %14 {approx = true} : vector<1x1xf32> -> vector<1x1xf32>
    %16 = vector.broadcast %15 : vector<1x1xf32> to vector<1x256xf32>
    %17 = arith.mulf %12, %16 : vector<1x256xf32>
    %18 = vector.broadcast %17 : vector<1x256xf32> to vector<5x256xf32>
    %19 = arith.mulf %6, %18 : vector<5x256xf32>
    %cst_12 = arith.constant dense<0.000000e+00> : vector<5xf32>
    %20 = vector.multi_reduction <add>, %19, %cst_12 [1] : vector<5x256xf32> to vector<5xf32>
    %21 = vector.shape_cast %20 : vector<5xf32> to vector<5x1xf32>
    %cst_13 = arith.constant dense<0.000000e+00> : vector<8x1xf32>
    %22 = tpu.matmul %1, %21, %cst_13 {dimension_numbers = #tpu.dot_dimension_numbers<[1], [0], [0], [1], [0, 0, 1, 1], [], []>} : vector<8x5xf32>, vector<5x1xf32>, vector<8x1xf32> -> vector<8x1xf32>
    %cst_14 = arith.constant 0.000000e+00 : f32
    %23 = vector.broadcast %cst_14 : f32 to vector<8x1xf32>
    %24 = arith.subf %23, %22 : vector<8x1xf32>
    %25 = math.exp %24 : vector<8x1xf32>
    %cst_15 = arith.constant 1.000000e+00 : f32
    %26 = vector.broadcast %cst_15 : f32 to vector<8x1xf32>
    %27 = arith.addf %26, %25 : vector<8x1xf32>
    %28 = tpu.reciprocal %27 {approx = true} : vector<8x1xf32> -> vector<8x1xf32>
    %29 = vector.broadcast %28 : vector<8x1xf32> to vector<8x256xf32>
    %30 = arith.mulf %5, %29 : vector<8x256xf32>
    %cst_16 = arith.constant dense<0.000000e+00> : vector<8xf32>
    %31 = vector.multi_reduction <add>, %30, %cst_16 [1] : vector<8x256xf32> to vector<8xf32>
    %32 = vector.shape_cast %31 : vector<8xf32> to vector<8x1xf32>
    %cst_17 = arith.constant 2.560000e+02 : f32
    %33 = vector.broadcast %cst_17 : f32 to vector<8x1xf32>
    %34 = arith.divf %32, %33 : vector<8x1xf32>
    %cst_18 = arith.constant dense<0.000000e+00> : vector<4x1xf32>
    %35 = tpu.matmul %2, %34, %cst_18 {dimension_numbers = #tpu.dot_dimension_numbers<[1], [0], [0], [1], [0, 0, 1, 1], [], []>} : vector<4x8xf32>, vector<8x1xf32>, vector<4x1xf32> -> vector<4x1xf32>
    %36 = vector.broadcast %35 : vector<4x1xf32> to vector<4x8xf32>
    %37 = arith.mulf %3, %36 : vector<4x8xf32>
    %cst_19 = arith.constant dense<0.000000e+00> : vector<8xf32>
    %38 = vector.multi_reduction <add>, %37, %cst_19 [0] : vector<4x8xf32> to vector<8xf32>
    %39 = vector.shape_cast %38 : vector<8xf32> to vector<1x8xf32>
    %cst_20 = arith.constant dense<0.000000e+00> : vector<1x256xf32>
    %40 = tpu.matmul %39, %30, %cst_20 {dimension_numbers = #tpu.dot_dimension_numbers<[1], [0], [0], [1], [0, 0, 1, 1], [], []>} : vector<1x8xf32>, vector<8x256xf32>, vector<1x256xf32> -> vector<1x256xf32>
    %cst_21 = arith.constant dense<0xFF800000> : vector<1xf32>
    %41 = vector.multi_reduction <maximumf>, %40, %cst_21 [1] : vector<1x256xf32> to vector<1xf32>
    %42 = vector.shape_cast %41 : vector<1xf32> to vector<1x1xf32>
    %43 = vector.broadcast %42 : vector<1x1xf32> to vector<1x256xf32>
    %44 = arith.subf %40, %43 : vector<1x256xf32>
    %45 = math.exp %44 : vector<1x256xf32>
    %cst_22 = arith.constant dense<0.000000e+00> : vector<1xf32>
    %46 = vector.multi_reduction <add>, %45, %cst_22 [1] : vector<1x256xf32> to vector<1xf32>
    %47 = vector.shape_cast %46 : vector<1xf32> to vector<1x1xf32>
    %48 = tpu.reciprocal %47 {approx = true} : vector<1x1xf32> -> vector<1x1xf32>
    %49 = vector.broadcast %48 : vector<1x1xf32> to vector<1x256xf32>
    %50 = arith.mulf %45, %49 : vector<1x256xf32>
    %cst_23 = arith.constant 0.000000e+00 : f32
    %51 = vector.broadcast %cst_23 : f32 to vector<1x256xf32>
    %52 = arith.subf %51, %50 : vector<1x256xf32>
    %53 = math.exp %52 : vector<1x256xf32>
    %cst_24 = arith.constant 1.000000e+00 : f32
    %54 = vector.broadcast %cst_24 : f32 to vector<1x256xf32>
    %55 = arith.addf %54, %53 : vector<1x256xf32>
    %56 = tpu.reciprocal %55 {approx = true} : vector<1x256xf32> -> vector<1x256xf32>
    %cst_25 = arith.constant 2.000000e+00 : f32
    %57 = vector.broadcast %cst_25 : f32 to vector<1x256xf32>
    %58 = arith.mulf %57, %56 : vector<1x256xf32>
    %59 = vector.broadcast %58 : vector<1x256xf32> to vector<8x256xf32>
    %60 = arith.mulf %30, %59 : vector<8x256xf32>
    %c0_26 = arith.constant 0 : index
    %c0_27 = arith.constant 0 : index
    %c0_28 = arith.constant 0 : index
    %61 = vector.load %arg6[%c0_26, %c0_27, %c0_28] : memref<1x8x256xf32, #tpu.memory_space<vmem>>, vector<1x8x256xf32>
    %62 = vector.shape_cast %61 : vector<1x8x256xf32> to vector<8x256xf32>
    %63 = vector.shape_cast %60 : vector<8x256xf32> to vector<1x8x256xf32>
    tpu.vector_store %arg6[%c0_26, %c0_27, %c0_28], %63 {strides = array<i32>} : memref<1x8x256xf32, #tpu.memory_space<vmem>>, vector<1x8x256xf32>,
    return
  }
  func.func @transform_0(%arg0: i32) -> (i32, i32, i32) {
    %c0_i32 = arith.constant 0 : i32
    %c0_i32_0 = arith.constant 0 : i32
    %c0_i32_1 = arith.constant 0 : i32
    return %arg0, %c0_i32, %c0_i32_0 : i32, i32, i32
  }
  func.func @transform_1(%arg0: i32) -> (i32, i32) {
    %c0_i32 = arith.constant 0 : i32
    %c0_i32_0 = arith.constant 0 : i32
    %c0_i32_1 = arith.constant 0 : i32
    return %c0_i32, %c0_i32_0 : i32, i32
  }
  func.func @transform_2(%arg0: i32) -> (i32, i32) {
    %c0_i32 = arith.constant 0 : i32
    %c0_i32_0 = arith.constant 0 : i32
    %c0_i32_1 = arith.constant 0 : i32
    return %c0_i32, %c0_i32_0 : i32, i32
  }
  func.func @transform_3(%arg0: i32) -> (i32, i32) {
    %c0_i32 = arith.constant 0 : i32
    %c0_i32_0 = arith.constant 0 : i32
    %c0_i32_1 = arith.constant 0 : i32
    return %c0_i32, %c0_i32_0 : i32, i32
  }
  func.func @transform_4(%arg0: i32) -> (i32, i32) {
    %c0_i32 = arith.constant 0 : i32
    %c0_i32_0 = arith.constant 0 : i32
    %c0_i32_1 = arith.constant 0 : i32
    return %c0_i32, %c0_i32_0 : i32, i32
  }
  func.func @transform_5(%arg0: i32) -> (i32, i32, i32) {
    %c0_i32 = arith.constant 0 : i32
    %c0_i32_0 = arith.constant 0 : i32
    %c0_i32_1 = arith.constant 0 : i32
    return %arg0, %c0_i32, %c0_i32_0 : i32, i32, i32
  }
}

</mosaic_0001>

<bundles_post_ra>
// kernel: tpu_custom_call.1
= control target key start
LH: loop header
LB: loop body
LE: loop exit
PB: predicated region body
PF: predicated region fallthrough
CT: control target
= control target key end

     0   :  { %10 = vsyncpa [#allocation3], 0  ;;  %s1405_s0 = inlined_call_operand.hbm [shape: f32[2,8,256], index: 0, kind: input, shape index: {}]   ;;  %s1406_s1 = inlined_call_operand.hbm [shape: f32[5,8], index: 1, kind: input, shape index: {}]   ;;  %s1407_s2 = inlined_call_operand.hbm [shape: f32[8,5], index: 2, kind: input, shape index: {}]   ;;  %s1408_s3 = inlined_call_operand.vmem [shape: f32[4,8], index: 3, kind: input, shape index: {}]   ;;  %s1409_s4 = inlined_call_operand.hbm [shape: f32[4,8], index: 4, kind: input, shape index: {}]   ;;  %s1410_s5 = inlined_call_operand.hbm [shape: f32[2,8,256], index: 5, kind: output, shape index: {}]  }
   0x1   :  { %12 = vsyncpa [#allocation3 + $0x1], 0 }
   0x2   :  { %13 = vsyncpa [#allocation6], 0 }
   0x3   :  { %14 = vsyncpa [#allocation9], 0 }
   0x4   :  { %15 = vsyncpa [#allocation4], 0 }
   0x5   :  { %17 = vsyncpa [#allocation4 + $0x1], 0  ;;  %s1173_s18 = smov 0   ;;  %s1175_s19 = smov 0  }
   0x6   :  { %s1177_s20 = smov 0   ;;  %s1179_s21 = smov 0  }
   0x7 LB: > { %s1194_s22 = sadd.s32 4294967295, %s1133_s21   ;;  %s808_s23 = sadd.s32 4294967294, %s1133_s21   ;;  %s1133_s21 = sphi %s1179_s21, %s1434_s21   ;;  %s1129_s20 = sphi %s1177_s20, %s1433_s20   ;;  %s1125_s19 = sphi %s1175_s19, %s1432_s19   ;;  %s1121_s18 = sphi %s1173_s18, %s1431_s18  }
   0x8   : > { %p43_p0 = scmp.ne.s32.totalorder %s1125_s19, %s1121_s18  ;;  %p1411_p1 = scmp.eq.s32.totalorder %s1194_s22, 0 }
   0x9   : > { %p157_p3 = scmp.eq.s32.totalorder %s808_s23, 1  ;;  %p809_p5 = scmp.ge.s32.totalorder %s1133_s21, 1 }
   0xa   : > { %p1203_p4 = por %p1411_p1, %p43_p0  ;;  %p164_p7 = scmp.lt.s32.totalorder %s1133_s21, 3 }
   0xb   : > { %p1208_p6 = por %p157_p3, %p43_p0  ;;  %s1135_s27 = smov [#allocation5]  }
   0xc   : > { %s1415_s24 = scalar_select %p1203_p4, 1, 0 }
   0xd   : > { %s1416_s25 = scalar_select %p1208_p6, 1, 0 }
   0xe   : > { %p1213_p8 = pnand %p809_p5, %p164_p7  ;;  %s177_s28 = sshll.u32 %s1135_s27, 4  ;;  %s178_s28 = int_to_ptr.vmem [resolvable:$true] %s177_s28 }
   0xf   : > { %s1136_s29 = smov [#allocation7]   ;;  %s1137_s7 = smov [#allocation8]  }
  0x10   : > { %s1417_s26 = scalar_select %p1213_p8, 1, 0 }
  0x11   : > { %p865_p10 = pneg %p1213_p8  ;;  %s188_s30 = sshll.u32 %s1136_s29, 4  ;;  %s189_s30 = int_to_ptr.vmem [resolvable:$true] %s188_s30 }
  0x12   : > { %s202_s8 = sshll.u32 %s1137_s7, 4  ;;  %s966_s9 = scalar_lea.vmem %s178_s28, 128  ;;  %s1226_s8 = int_to_ptr.vmem [resolvable:$true] %s202_s8 }
  0x13   : > { %p1222_p11 = pnand %p865_p10, %p1411_p1  ;;  %p967_p13 = scmp.ne.s32.totalorder %s178_s28, %s966_s9 }
  0x14   : > { %p974_p5 = scmp.lt.s32.totalorder %s178_s28, %s178_s28  ;;  %p975_p7 = scmp.lt.s32.totalorder %s966_s9, %s966_s9 }
  0x15   : > { %p957_p12 = pneg %p1222_p11 }
  0x16   : > { %p976_p10 = por %p975_p7, %p974_p5 }
  0x17   : > { %p969_p0 = pnand %p967_p13, %p957_p12 }
  0x19   : > { %p970_p3 = pneg %p969_p0 }
  0x1b   : > { %p977_p9 = pnand %p976_p10, %p970_p3 }
  0x1d   : > { %980 = shalt.err (!%p977_p9)
}
  0x1e   : > { %868 = dma.hbm_to_vmem [thread:$0]  (!%p1222_p11), %s1406_s1, 128, %s178_s28, [#allocation6]  }
  0x1f   : > { %s992_s12 = scalar_lea.vmem %s189_s30, 128  ;;  %p1000_p13 = scmp.lt.s32.totalorder %s189_s30, %s189_s30 }
  0x20   : > { %p993_p1 = scmp.ne.s32.totalorder %s189_s30, %s992_s12  ;;  %p1001_p0 = scmp.lt.s32.totalorder %s992_s12, %s992_s12 }
  0x22   : > { %p995_p2 = pnand %p993_p1, %p957_p12  ;;  %p1002_p4 = por %p1001_p0, %p1000_p13 }
  0x24   : > { %p996_p6 = pneg %p995_p2 }
  0x26   : > { %p1003_p8 = pnand %p1002_p4, %p996_p6 }
  0x28   : > { %1006 = shalt.err (!%p1003_p8)
}
  0x29   : > { %871 = dma.hbm_to_vmem [thread:$0]  (!%p1222_p11), %s1407_s2, 128, %s189_s30, [#allocation6]  }
  0x2a   : > { %s1018_s15 = scalar_lea.vmem %s1226_s8, 64  ;;  %p1026_p3 = scmp.lt.s32.totalorder %s1226_s8, %s1226_s8 }
  0x2b   : > { %p1019_p9 = scmp.ne.s32.totalorder %s1226_s8, %s1018_s15  ;;  %p1027_p4 = scmp.lt.s32.totalorder %s1018_s15, %s1018_s15 }
  0x2d   : > { %p1021_p1 = pnand %p1019_p9, %p957_p12  ;;  %p1028_p6 = por %p1027_p4, %p1026_p3 }
  0x2f   : > { %p1022_p2 = pneg %p1021_p1 }
  0x31   : > { %p1029_p8 = pnand %p1028_p6, %p1022_p2 }
  0x33   : > { %1032 = shalt.err (!%p1029_p8)
}
  0x34   : > { %874 = dma.hbm_to_vmem [thread:$0]  (!%p1222_p11), %s1409_s4, 64, %s1226_s8, [#allocation9]  }
  0x35   : > { %s1260_s23 = sadd.s32 1, %s1133_s21   ;;  %s30_s28 = sadd.s32 1, %s1129_s20 }
  0x36   : > { %s27_s27 = ssub.s32 %s1133_s21, %s1260_s23  ;;  %p37_p5 = scmp.ne.s32.totalorder %s1129_s20, %s1125_s19 }
  0x37   : > { %p28_p12 = scmp.eq.s32.totalorder %s27_s27, 0  ;;  %p38_p7 = scmp.eq.s32.totalorder %s1133_s21, 0 }
  0x38   : > { %p886_p10 = scmp.lt.s32.totalorder %s1133_s21, 2  ;;  %p1419_p0 = scmp.eq.s32.totalorder %s1194_s22, 1 }
  0x39   : > { %s1270_s29 = scalar_select %p28_p12, %s1129_s20, %s30_s28  }
  0x3a   : > { %p39_p13 = por %p38_p7, %p37_p5  ;;  %p1274_p9 = por %p1419_p0, %p37_p5 }
  0x3b   : > { %s213_s6 = sand.u32 1, %s1129_s20   ;;  %s833_s7 = sshll.u32 %s1133_s21, 8 }
  0x3c   : > { %s1420_s30 = scalar_select %p1274_p9, 1, 0 }
  0x3d   : > { %s814_s8 = sshll.u32 %s213_s6, 4  ;;  %s1283_s11 = scalar_lea.hbm %s1405_s0, %s833_s7 }
  0x3e   : > { %s217_s12 = scalar_lea.vmem [#allocation2], %s814_s8  ;;  %p1285_p11 = pnand %p886_p10, %p39_p13 }
  0x3f   : > { %s225_s13 = sshll.u32 %s217_s12, 4  ;;  %s214_s15 = scalar_lea.sflag [#allocation3], %s213_s6  ;;  %s226_s13 = int_to_ptr.vmem [resolvable:$true] %s225_s13 }
  0x40   : > { %s1033_s16 = scalar_lea.hbm %s1283_s11, 256  ;;  %p1035_p2 = pneg %p1285_p11 }
  0x41   : > { %p1034_p1 = scmp.ne.s32.totalorder %s1283_s11, %s1033_s16  ;;  %s1038_s28 = scalar_lea.hbm %s1405_s0, 512 }
  0x42   : > { %p1039_p6 = scmp.lt.s32.totalorder %s1283_s11, %s1405_s0  ;;  %p1040_p8 = scmp.lt.s32.totalorder %s1038_s28, %s1033_s16 }
  0x43   : > { %p1036_p3 = pnand %p1035_p2, %p1034_p1 }
  0x44   : > { %p1041_p12 = por %p1040_p8, %p1039_p6 }
  0x45   : > { %p1037_p4 = pneg %p1036_p3 }
  0x47   : > { %p1042_p5 = pnand %p1041_p12, %p1037_p4 }
  0x49   : > { %1045 = shalt.err (!%p1042_p5)
}
  0x4a   : > { %s1046_s9 = scalar_lea.vmem %s226_s13, 256  ;;  %s1138_s6 = smov [#allocation2]  }
  0x4b   : > { %p1047_p7 = scmp.ne.s32.totalorder %s226_s13, %s1046_s9  ;;  %s1051_s10 = sshll.u32 %s1138_s6, 4  ;;  %s1052_s10 = int_to_ptr.vmem [resolvable:$false] %s1051_s10 }
  0x4c   : > { %s1053_s12 = scalar_lea.vmem %s1052_s10, 512  ;;  %p1054_p0 = scmp.lt.s32.totalorder %s226_s13, %s1052_s10 }
  0x4d   : > { %p1049_p10 = pnand %p1047_p7, %p1035_p2  ;;  %p1055_p1 = scmp.lt.s32.totalorder %s1053_s12, %s1046_s9 }
  0x4f   : > { %p1050_p13 = pneg %p1049_p10  ;;  %p1056_p3 = por %p1055_p1, %p1054_p0 }
  0x51   : > { %p1057_p9 = pnand %p1056_p3, %p1050_p13 }
  0x53   : > { %1060 = shalt.err (!%p1057_p9)
}
  0x54   : > { %878 = dma.hbm_to_vmem [thread:$0]  (!%p1285_p11), %s1283_s11, 256, %s226_s13, %s214_s15  }
  0x55   : > { %p1422_p4 = scmp.ne.s32.totalorder %s1417_s26, 0 }
  0x56   : > { %s1306_s16 = sand.u32 (!%p1422_p4), 1, %s1125_s19   ;;  %p1423_p2 = scmp.ne.s32.totalorder (!%p1422_p4), %s1415_s24, 0 }
  0x57   : > { %234 = sbr.rel (%p1422_p4) target bundleno = 2155 (0x86b), region = 40  ;;  %s818_s17 = sshll.u32 (!%p1422_p4), %s1306_s16, 4 }
  0x58   : > { %s237_s27 = scalar_lea.sflag (!%p1422_p4), [#allocation3], %s1306_s16  ;;  %s240_s28 = scalar_lea.vmem (!%p1422_p4), [#allocation2], %s818_s17 }
  0x5c   : > { %1104 = dma.done.wait (%p1423_p2), %s237_s27, 256  }
  0x5d   : > { %1106 = vsyncadd (%p1423_p2), %s237_s27, 4294967040  ;;  %p1424_p9 = scmp.eq.s32.totalorder %s1194_s22, 0 }
  0x5f   : > { %1108 = dma.done.wait (%p1424_p9), [#allocation6], 256   ;;  %p1425_p11 = pmov %p1424_p9 }
  0x60   : > { %p1426_p6 = pmov %p1424_p9 }
  0x61   : > { %1110 = vsyncadd (%p1425_p11), [#allocation6], 4294967040 }
  0x62   : > { %1112 = dma.done.wait (%p1426_p6), [#allocation9], 64   ;;  %p1427_p8 = pmov %p1426_p6 }
  0x63   : > { %v1139_v0 = vmov 0.0   ;;  %v1324_v1 = vld [vmem:[%s240_s28 + $0x8] sm:$0xff]  ;;  %v1326_v2 = vld [vmem:[%s240_s28] sm:$0xff]  ;;  %vm285_vm0 = vcmask 64512   ;;  %vm360_vm1 = vcmask 1040384   ;;  %v380_v20 = vlaneseq  ;;  %s834_s11 = sshll.u32 %s1194_s22, 8 }
  0x64   : > { %1114 = vsyncadd (%p1427_p8), [#allocation9], 4294967232  ;;  %353 = vmatprep.mubr.f32.mxu0 %v1139_v0  ;;  %839 = vmatprep.subr.mxu1 %v1139_v0  ;;  %v279_v3 = vld [vmem:[#allocation5] sm:$0x1f]  ;;  %vm390_vm2 = vcmask 1044480   ;;  %vm1140_vm3 = vmmov 0   ;;  %s1368_s8 = scalar_lea.hbm %s1410_s5, %s834_s11 }
  0x65   : > { %319 = vmatprep.subr.mxu0 %v1324_v1  ;;  %v381_v21 = vshrl.u32 %v380_v20, 7  ;;  %841 = vmatprep.mubr.msk.f32.mxu1 %vm1140_vm3, %v1139_v0  ;;  %v280_v33 = vld [vmem:[#allocation7] sm:$0xff]  ;;  %vm396_vm4 = vcmask 39936   ;;  %v1141_v35 = vmov 0   ;;  %v281_v49 = vld [vmem:[%s1408_s3] sm:$0xf] }
  0x66   : > { %320 = vmatpush1.msra.mxu0 %v1326_v2  ;;  %929 = vset.pattern.permute.xlu1 %v1141_v35  ;;  %v282_v52 = vld [vmem:[#allocation8] sm:$0xf]  ;;  %vm569_vm5 = vcmask 60416   ;;  %s278_s13 = scalar_lea.vmem [#allocation10], %s818_s17  ;;  %s695_s9 = scalar_lea.sflag [#allocation4], %s1306_s16 }
  0x67   : > { %823 = vmatmul.mubr.msk.f32.vlgmr.msra.gmra.mxu0 %vm285_vm0, %v279_v3  ;;  %844 = vmatprep.subr.mxu0 %v1139_v0  ;;  %v1335_v22 = vsub.s32 0, %v381_v21  ;;  %s709_s14 = sshll.u32 %s278_s13, 4  ;;  %p1428_p5 = scmp.ne.s32.totalorder %s1420_s30, 0  ;;  %s710_s14 = int_to_ptr.vmem [resolvable:$true] %s709_s14 }
  0x68   : > { %846 = vmatprep.mubr.msk.f32.mxu0 %vm1140_vm3, %v1139_v0  ;;  %930 = vset.pattern.permute.xlu0 %v1141_v35  ;;  %s1061_s6 = scalar_lea.vmem %s710_s14, 256  ;;  %s1142_s22 = smov [#allocation10]  }
  0x69   : > { %p1062_p12 = scmp.ne.s32.totalorder %s710_s14, %s1061_s6  ;;  %s1065_s10 = sshll.u32 %s1142_s22, 4  ;;  %s1066_s10 = int_to_ptr.vmem [resolvable:$false] %s1065_s10 }
  0x6a   : > { %s1067_s12 = scalar_lea.vmem %s1066_s10, 512  ;;  %p1068_p13 = scmp.lt.s32.totalorder %s710_s14, %s1066_s10 }
  0x6b   : > { %p1063_p7 = pnand %p1062_p12, %p1428_p5  ;;  %p1069_p0 = scmp.lt.s32.totalorder %s1067_s12, %s1061_s6 }
  0x6d   : > { %p1064_p10 = pneg %p1063_p7  ;;  %p1070_p1 = por %p1069_p0, %p1068_p13 }
  0x6f   : > { %p1071_p3 = pnand %p1070_p1, %p1064_p10 }
 0x127   : > { %v355_v4 = vpop.f32.mrf.mxu0 }
 0x128   : > { %v361_v6 = vsel %vm360_vm1, %v355_v4, -inf }
 0x129   : > { %v357_v5 = vpop.f32.mrf.mxu0 }
 0x12a   : > { %v362_v7 = vsel %vm360_vm1, %v357_v5, -inf }
 0x12b   : > { %v363_v8 = vmax.f32 %v361_v6, %v362_v7 }
 0x12d   : > { %364 = vmax.xlane.f32.xlu0 %v363_v8 }
 0x1b6   : > { %v365_v9 = vpop.xlane.xlu0 %364 }
 0x1b7   : > { %v366_v10 = vsub.f32 %v355_v4, %v365_v9  ;;  %v367_v11 = vsub.f32 %v357_v5, %v365_v9 }
 0x1b9   : > { %v368_v12 = vmul.f32 1.442695, %v366_v10  ;;  %v370_v13 = vmul.f32 1.442695, %v367_v11 }
 0x1bb   : > { %931 = vpow2.f32 %v368_v12 }
 0x1bc   : > { %933 = vpow2.f32 %v370_v13 }
 0x1c8   : > { %v932_v14 = vpop.eup %931 }
 0x1c9   : > { %v934_v15 = vpop.eup %933  ;;  %v372_v16 = vsel %vm360_vm1, %v932_v14, 0.0 }
 0x1ca   : > { %v373_v17 = vsel %vm360_vm1, %v934_v15, 0.0 }
 0x1cb   : > { %v374_v18 = vadd.f32 %v373_v17, %v372_v16 }
 0x1cd   : > { %375 = vadd.xlane.f32.xlu0 %v374_v18 }
 0x256   : > { %v376_v19 = vpop.xlane.xlu0 %375 }
 0x257   : > { %935 = vrcp.f32 %v376_v19 }
 0x264   : > { %v936_v23 = vpop.eup %935 }
 0x265   : > { %v378_v24 = vmul.f32 %v936_v23, %v932_v14  ;;  %v379_v25 = vmul.f32 %v936_v23, %v934_v15 }
 0x267   : > { %v383_v26 = vrot.slane %v378_v24, %v1335_v22  ;;  %v387_v27 = vrot.slane %v379_v25, %v1335_v22 }
 0x269   : > { %v388_v28 = vmul.f32 %v383_v26, %v355_v4  ;;  %v389_v29 = vmul.f32 %v387_v27, %v357_v5 }
 0x26b   : > { %v391_v30 = vsel %vm390_vm2, %v388_v28, 0.0  ;;  %v392_v31 = vsel %vm390_vm2, %v389_v29, 0.0 }
 0x26c   : > { %v393_v32 = vadd.f32 %v392_v31, %v391_v30 }
 0x26e   : > { %394 = vadd.xlane.f32.xlu1 %v393_v32 }
 0x2f7   : > { %v395_v34 = vpop.xlane.xlu1 %394 }
 0x2f8   : > { %840 = vmatpush3.msk.msra.mxu1 %vm390_vm2, %v395_v34 }
 0x2f9   : > { %842 = vmatmul.mubr.msk.f32.vlgmr.msra.gmra.mxu1 %vm396_vm4, %v280_v33 }
 0x2fa   : > { %644 = vmatprep.mubr.f32.mxu1 %v1139_v0 }
 0x3b9   : > { %v469_v36 = vpop.f32.mrf.mxu1 }
 0x3ba   : > { %v473_v37 = vsub.f32 0.0, %v469_v36 }
 0x3bb   : > { %v843_v38 = vpop.f32.mrf.mxu1 }
 0x3bc   : > { %v474_v39 = vmul.f32 1.442695, %v473_v37 }
 0x3be   : > { %937 = vpow2.f32 %v474_v39 }
 0x3cb   : > { %v938_v40 = vpop.eup %937 }
 0x3cc   : > { %v476_v41 = vadd.f32 1.0, %v938_v40 }
 0x3ce   : > { %939 = vrcp.f32 %v476_v41 }
 0x3db   : > { %v940_v42 = vpop.eup %939 }
 0x3dc   : > { %480 = vperm.xlu1 %929, %v940_v42  }
 0x457   : > { %v481_v43 = vpop.permute.xlu1 %480 }
 0x458   : > { %v1340_v44 = vmul.f32 %v481_v43, %v1326_v2  ;;  %v1343_v45 = vmul.f32 %v481_v43, %v1324_v1 }
 0x45a   : > { %610 = vmatprep.subr.mxu1 %v1343_v45  ;;  %v485_v46 = vadd.f32 %v1343_v45, %v1340_v44 }
 0x45b   : > { %611 = vmatpush1.msra.mxu1 %v1340_v44 }
 0x45c   : > { %486 = vadd.xlane.f32.xlu0 %v485_v46 }
 0x4e5   : > { %v487_v47 = vpop.xlane.xlu0 %486 }
 0x4e6   : > { %v489_v48 = vmul.f32 0.00390625, %v487_v47 }
 0x4e8   : > { %845 = vmatpush3.msra.mxu0 %v489_v48 }
 0x4e9   : > { %847 = vmatmul.mubr.msk.f32.vlgmr.msra.gmra.mxu0 %vm285_vm0, %v281_v49 }
 0x5a9   : > { %v559_v50 = vpop.f32.mrf.mxu0 }
 0x5aa   : > { %565 = vperm.xlu0 %930, %v559_v50  }
 0x5ab   : > { %v848_v51 = vpop.f32.mrf.mxu0 }
 0x625   : > { %v566_v53 = vpop.permute.xlu0 %565 }
 0x626   : > { %v568_v54 = vmul.f32 %v566_v53, %v282_v52 }
 0x628   : > { %v570_v55 = vsel %vm569_vm5, %v568_v54, 0.0 }
 0x629   : > { %v571_v56 = vrot.slane %v570_v55, 4 }
 0x62b   : > { %v572_v57 = vadd.f32 %v571_v56, %v570_v55 }
 0x62d   : > { %v573_v58 = vrot.slane %v572_v57, 2 }
 0x62f   : > { %v574_v59 = vadd.f32 %v573_v58, %v572_v57 }
 0x631   : > { %v575_v60 = vrot.slane %v574_v59, 1 }
 0x633   : > { %v576_v61 = vadd.f32 %v575_v60, %v574_v59 }
 0x635   : > { %827 = vmatmul.mubr.msk.f32.vlgmr.msra.gmra.mxu1 %vm285_vm0, %v576_v61 }
 0x6f5   : > { %v646_v62 = vpop.f32.mrf.mxu1 }
 0x6f6   : > { %v651_v0 = vsel %vm360_vm1, %v646_v62, -inf }
 0x6f7   : > { %v648_v63 = vpop.f32.mrf.mxu1 }
 0x6f8   : > { %v652_v1 = vsel %vm360_vm1, %v648_v63, -inf }
 0x6f9   : > { %v653_v2 = vmax.f32 %v651_v0, %v652_v1 }
 0x6fb   : > { %654 = vmax.xlane.f32.xlu1 %v653_v2 }
 0x784   : > { %v655_v3 = vpop.xlane.xlu1 %654 }
 0x785   : > { %v656_v4 = vsub.f32 %v646_v62, %v655_v3  ;;  %v657_v5 = vsub.f32 %v648_v63, %v655_v3 }
 0x787   : > { %v658_v6 = vmul.f32 1.442695, %v656_v4  ;;  %v660_v7 = vmul.f32 1.442695, %v657_v5 }
 0x789   : > { %941 = vpow2.f32 %v658_v6 }
 0x78a   : > { %943 = vpow2.f32 %v660_v7 }
 0x796   : > { %v942_v8 = vpop.eup %941 }
 0x797   : > { %v944_v9 = vpop.eup %943  ;;  %v662_v10 = vsel %vm360_vm1, %v942_v8, 0.0 }
 0x798   : > { %v663_v11 = vsel %vm360_vm1, %v944_v9, 0.0 }
 0x799   : > { %v664_v12 = vadd.f32 %v663_v11, %v662_v10 }
 0x79b   : > { %665 = vadd.xlane.f32.xlu0 %v664_v12 }
 0x824   : > { %v666_v13 = vpop.xlane.xlu0 %665 }
 0x825   : > { %945 = vrcp.f32 %v666_v13 }
 0x832   : > { %v946_v14 = vpop.eup %945 }
 0x833   : > { %v668_v15 = vmul.f32 %v946_v14, %v942_v8  ;;  %v669_v16 = vmul.f32 %v946_v14, %v944_v9 }
 0x835   : > { %v670_v17 = vsub.f32 0.0, %v668_v15  ;;  %v671_v18 = vsub.f32 0.0, %v669_v16 }
 0x837   : > { %v672_v19 = vmul.f32 1.442695, %v670_v17  ;;  %v674_v20 = vmul.f32 1.442695, %v671_v18 }
 0x839   : > { %947 = vpow2.f32 %v672_v19 }
 0x83a   : > { %949 = vpow2.f32 %v674_v20 }
 0x846   : > { %v948_v21 = vpop.eup %947 }
 0x847   : > { %v950_v23 = vpop.eup %949  ;;  %v676_v24 = vadd.f32 1.0, %v948_v21 }
 0x848   : > { %v677_v25 = vadd.f32 1.0, %v950_v23 }
 0x849   : > { %951 = vrcp.f32 %v676_v24 }
 0x84a   : > { %953 = vrcp.f32 %v677_v25 }
 0x856   : > { %v952_v26 = vpop.eup %951 }
 0x857   : > { %v954_v27 = vpop.eup %953  ;;  %v680_v28 = vmul.f32 2.0, %v952_v26 }
 0x858   : > { %v681_v29 = vmul.f32 2.0, %v954_v27 }
 0x859   : > { %v685_v30 = vrot.slane %v680_v28, %v1335_v22 }
 0x85a   : > { %v689_v31 = vrot.slane %v681_v29, %v1335_v22 }
 0x85b   : > { %v690_v32 = vmul.f32 %v685_v30, %v1340_v44 }
 0x85c   : > { %v691_v33 = vmul.f32 %v689_v31, %v1343_v45 }
 0x85d   : > { %692 = vst [vmem:[%s278_s13] sm:$0xff] %v690_v32 }
 0x85e   : > { %693 = vst [vmem:[%s278_s13 + $0x8] sm:$0xff] %v691_v33 }
 0x85f   : > { %1074 = shalt.err (!%p1071_p3)
}
 0x860   : > { %s1075_s17 = scalar_lea.hbm %s1368_s8, 256  ;;  %s1079_s28 = scalar_lea.hbm %s1410_s5, 512 }
 0x861   : > { %p1076_p4 = scmp.ne.s32.totalorder %s1368_s8, %s1075_s17  ;;  %p1080_p11 = scmp.lt.s32.totalorder %s1368_s8, %s1410_s5 }
 0x862   : > { %p1081_p6 = scmp.lt.s32.totalorder %s1079_s28, %s1075_s17 }
 0x863   : > { %p1077_p2 = pnand %p1076_p4, %p1428_p5 }
 0x864   : > { %p1082_p8 = por %p1081_p6, %p1080_p11 }
 0x865   : > { %p1078_p9 = pneg %p1077_p2 }
 0x867   : > { %p1083_p12 = pnand %p1082_p8, %p1078_p9 }
 0x869   : > { %1086 = shalt.err (!%p1083_p12)
}
 0x86a   : > { %863 = dma.vmem_to_hbm [thread:$0]  (%p1428_p5), %s710_s14, 256, %s1368_s8, %s695_s9  }
 0x86b PF: > { %s721_s11 = sand.u32 1, %s1121_s18   ;;  %p1429_p7 = scmp.ne.s32.totalorder %s1416_s25, 0 }
 0x86c   : > { %p1430_p10 = scmp.ge.s32.totalorder %s1133_s21, 2  ;;  %s722_s13 = scalar_lea.sflag [#allocation4], %s721_s11 }
 0x86e   : > { %p880_p13 = pnand %p1430_p10, %p1429_p7 }
 0x870   : > { %p881_p0 = pneg %p880_p13 }
 0x872   : > { %1116 = dma.done.wait (%p881_p0), %s722_s13, 256  }
 0x873   : > { %1118 = vsyncadd (%p881_p0), %s722_s13, 4294967040  ;;  %p20_p1 = scmp.ge.s32.totalorder %s1260_s23, 4   ;;  %s1431_s18 = smov %s1125_s19 }
 0x874   : > { %s1432_s19 = smov %s1129_s20  ;;  %s1433_s20 = smov %s1270_s29 }
 0x875   : > { %s1434_s21 = smov %s1260_s23  ;;  %22 = sbr.rel (!%p20_p1) target bundleno = 7 (0x7), region = 97 }
 0x87a   :  { %727 = vsyncpa [#allocation3], 1 }
 0x87b   :  { %729 = vsyncpa [#allocation3 + $0x1], 1 }
 0x87c   :  { %730 = vsyncpa [#allocation6], 1 }
 0x87d   :  { %731 = vsyncpa [#allocation9], 1 }
 0x87e   :  { %732 = vsyncpa [#allocation4], 1 }
 0x87f   :  { %734 = vsyncpa [#allocation4 + $0x1], 1 }

</bundles_post_ra>
